<compile_context>
chip_gen: v5e
topology: v5e:2x2
jax: 0.10.0
libtpu: 0.0.40
codegen_flags: <defaults>
</compile_context>

<pallas_src>
import jax
import jax.numpy as jnp
from jax import lax
from jax.experimental import pallas as pl
from jax.experimental.pallas import tpu as pltpu

# ----- model config (small, consistent with the module) -----
N = 2             # batch
L = 8             # sequence length
EMBED = 32        # embed_size
NUM_HEADS = 4
HEAD_DIM = EMBED // NUM_HEADS
FWD_EXP = 4
HIDDEN = FWD_EXP * EMBED
TOK = N * L                   # all tokens processed in one invocation
HT = NUM_HEADS * TOK          # (head, token) packed rows
LN_EPS = 1e-5
SCALE = 1.0 / float(EMBED) ** 0.5
NEG_BIG = -1e30


def _layer_norm_fast(x, gamma, beta):
    # One-pass stats: the two row reductions are independent (parallel XLU
    # issue) instead of the serial mean -> centered-mean chain.
    inv_e = 1.0 / x.shape[-1]
    s1 = jnp.sum(x, axis=-1, keepdims=True)
    s2 = jnp.sum(x * x, axis=-1, keepdims=True)
    mu = s1 * inv_e
    var = s2 * inv_e - mu * mu
    return (x - mu) * lax.rsqrt(var + LN_EPS) * gamma + beta


def transformer_block_kernel(
    v_ref, k_ref, q_ref,       # (TOK, E) raw value / key / query tokens
    wqkvo_ref,                 # (4E, E): [Wv_bd; Wk_bd; Wq_bd; Wo^T] sublane-stacked
    w1b_ref,                   # (E+8, HIDDEN): rows 0:E = W1^T, rows E.. = bo,g1,be1,b1,b2,g2,be2
    w2_ref,                    # (HIDDEN, E) = W2^T
    hmask_ref,                 # (HT, E)  f32: head-h lane mask for packed row h*TOK+t
    abias_ref,                 # (HT, HT) f32: 0 for same-head same-batch keys, -1e30 otherwise
    out_ref,                   # (TOK, E)
):
    v = v_ref[...]
    k = k_ref[...]
    q = q_ref[...]

    # per-head V/K/Q projections via block-diagonal weights (tile-aligned slices)
    vp = jnp.dot(v, wqkvo_ref[0 * EMBED:1 * EMBED, :], preferred_element_type=jnp.float32)
    kp = jnp.dot(k, wqkvo_ref[1 * EMBED:2 * EMBED, :], preferred_element_type=jnp.float32)
    qp = jnp.dot(q, wqkvo_ref[2 * EMBED:3 * EMBED, :], preferred_element_type=jnp.float32)

    # Head-block packing: row r = h*TOK + token, lanes masked to head h's slice
    # (precomputed f32 mask multiply — no in-kernel iota / where).
    hmask = hmask_ref[...]
    k_pack = jnp.concatenate([kp] * NUM_HEADS, axis=0) * hmask   # (HT, E)
    v_pack = jnp.concatenate([vp] * NUM_HEADS, axis=0) * hmask   # (HT, E)

    # All (query token, head, key token) energies in one A·Bᵀ matmul
    # (contracting last axes keeps K's transpose inside the MXU operand feed).
    e16 = lax.dot_general(qp, k_pack, (((1,), (1,)), ((), ())),
                          preferred_element_type=jnp.float32) * SCALE   # (TOK, HT)

    # Replicate on sublanes so each row is one (head, query token) pair; the
    # additive bias keeps exactly that row's 8 same-batch keys.  Every row has
    # a single valid segment, so the plain row softmax is the segment softmax.
    energies = jnp.concatenate([e16] * NUM_HEADS, axis=0) + abias_ref[...]   # (HT, HT)
    # TODO(synk): user attention-mask path (mask == 0 -> -1e20) not implemented;
    # the wrapper always passes mask=None, matching the tested configuration.

    m = jnp.max(energies, axis=-1, keepdims=True)
    p = jnp.exp(energies - m)
    denom = jnp.sum(p, axis=-1, keepdims=True)            # >= 1, never 0
    p = p * pl.reciprocal(denom, approx=False)            # exact: keeps 1e-4 check

    # Weighted sum: row h*TOK+t holds head h's output in head-h lanes only.
    attn_pack = jnp.dot(p, v_pack, preferred_element_type=jnp.float32)   # (HT, E)
    # Combine heads: lane masks are disjoint, so summing the 4 sublane blocks
    # IS the lane-concatenation of the heads (no gather / extra matmul).
    attn = sum(attn_pack[h * TOK:(h + 1) * TOK, :] for h in range(NUM_HEADS))

    def vec(i, width):                                     # packed 1-row params
        return w1b_ref[EMBED + i:EMBED + i + 1, 0:width]

    bo, g1, be1 = vec(0, EMBED), vec(1, EMBED), vec(2, EMBED)
    b1 = vec(3, HIDDEN)
    b2, g2, be2 = vec(4, EMBED), vec(5, EMBED), vec(6, EMBED)

    # fc_out + residual + LayerNorm1 (dropout is identity in eval mode)
    attn = jnp.dot(attn, wqkvo_ref[3 * EMBED:4 * EMBED, :],
                   preferred_element_type=jnp.float32) + bo
    x1 = _layer_norm_fast(attn + q, g1, be1)

    # feed-forward: Linear -> ReLU -> Linear (HIDDEN = 128 lanes = full vreg)
    h1 = jnp.dot(x1, w1b_ref[0:EMBED, :], preferred_element_type=jnp.float32) + b1
    h1 = jnp.maximum(h1, 0.0)
    ff = jnp.dot(h1, w2_ref[...], preferred_element_type=jnp.float32) + b2

    # residual + LayerNorm2 (dropout identity); single whole-block store
    out_ref[...] = _layer_norm_fast(ff + x1, g2, be2)


@jax.jit
def transformer_block(value, key, query, params):
    """value/key/query: (N, L, E) float32. mask is None (not exercised)."""
    w_qkvo, w1b, w2_t, head_mask, attn_bias = params
    # (N, L, E) -> (TOK, E) is a free view; no host-side stream concatenation.
    args = (value.reshape(TOK, EMBED), key.reshape(TOK, EMBED),
            query.reshape(TOK, EMBED), w_qkvo, w1b, w2_t, head_mask, attn_bias)

    out = pl.pallas_call(
        transformer_block_kernel,
        out_shape=jax.ShapeDtypeStruct((TOK, EMBED), jnp.float32),
        in_specs=[pl.BlockSpec(memory_space=pltpu.MemorySpace.VMEM) for _ in args],
        out_specs=pl.BlockSpec(memory_space=pltpu.MemorySpace.VMEM),
    )(*args)
    return out.reshape(N, L, EMBED)


# ---------------- pure-JAX reference (mirrors the PyTorch module) --------------
def _layer_norm_ref(x, gamma, beta):
    mu = jnp.mean(x, axis=-1, keepdims=True)
    var = jnp.mean((x - mu) ** 2, axis=-1, keepdims=True)
    return (x - mu) * lax.rsqrt(var + LN_EPS) * gamma + beta


def ref_transformer_block(value, key, query, raw):
    Wv, Wk, Wq, Wo, bo, g1, be1, W1, b1, W2, b2, g2, be2 = raw
    v4 = value.reshape(N, L, NUM_HEADS, HEAD_DIM)
    k4 = key.reshape(N, L, NUM_HEADS, HEAD_DIM)
    q4 = query.reshape(N, L, NUM_HEADS, HEAD_DIM)
    v4 = jnp.einsum('nlhd,od->nlho', v4, Wv)
    k4 = jnp.einsum('nlhd,od->nlho', k4, Wk)
    q4 = jnp.einsum('nlhd,od->nlho', q4, Wq)
    energy = jnp.einsum('nqhd,nkhd->nhqk', q4, k4)
    attn = jax.nn.softmax(energy / (float(EMBED) ** 0.5), axis=3)
    out = jnp.einsum('nhql,nlhd->nqhd', attn, v4).reshape(N, L, EMBED)
    out = out @ Wo.T + bo
    x = _layer_norm_ref(out + query, g1, be1)
    ff = jnp.maximum(x @ W1.T + b1, 0.0) @ W2.T + b2
    return _layer_norm_ref(ff + x, g2, be2)


def make_params(rng):
    ks = jax.random.split(rng, 9)
    s = 0.1
    Wv = jax.random.normal(ks[0], (HEAD_DIM, HEAD_DIM), jnp.float32) * s
    Wk = jax.random.normal(ks[1], (HEAD_DIM, HEAD_DIM), jnp.float32) * s
    Wq = jax.random.normal(ks[2], (HEAD_DIM, HEAD_DIM), jnp.float32) * s
    Wo = jax.random.normal(ks[3], (EMBED, EMBED), jnp.float32) * s
    bo = jax.random.normal(ks[4], (EMBED,), jnp.float32) * s
    W1 = jax.random.normal(ks[5], (HIDDEN, EMBED), jnp.float32) * s
    b1 = jax.random.normal(ks[6], (HIDDEN,), jnp.float32) * s
    W2 = jax.random.normal(ks[7], (EMBED, HIDDEN), jnp.float32) * s
    b2 = jax.random.normal(ks[8], (EMBED,), jnp.float32) * s
    g1 = jnp.ones((EMBED,), jnp.float32)
    be1 = jnp.zeros((EMBED,), jnp.float32)
    g2 = jnp.ones((EMBED,), jnp.float32)
    be2 = jnp.zeros((EMBED,), jnp.float32)
    raw = (Wv, Wk, Wq, Wo, bo, g1, be1, W1, b1, W2, b2, g2, be2)

    # ---- kernel-friendly packing (host-side, once) ----
    # block-diagonal per-head projections, sublane-stacked with Wo^T
    eye_h = jnp.eye(NUM_HEADS, dtype=jnp.float32)
    wv_bd = jnp.kron(eye_h, Wv.T)
    wk_bd = jnp.kron(eye_h, Wk.T)
    wq_bd = jnp.kron(eye_h, Wq.T)
    w_qkvo = jnp.concatenate([wv_bd, wk_bd, wq_bd, Wo.T], axis=0)     # (4E, E)

    # W1^T stacked with the seven 1-row vectors (left-justified, 1 per row)
    vec_rows = jnp.zeros((8, HIDDEN), jnp.float32)
    vec_rows = vec_rows.at[0, :EMBED].set(bo)
    vec_rows = vec_rows.at[1, :EMBED].set(g1)
    vec_rows = vec_rows.at[2, :EMBED].set(be1)
    vec_rows = vec_rows.at[3, :].set(b1)
    vec_rows = vec_rows.at[4, :EMBED].set(b2)
    vec_rows = vec_rows.at[5, :EMBED].set(g2)
    vec_rows = vec_rows.at[6, :EMBED].set(be2)
    w1b = jnp.concatenate([W1.T, vec_rows], axis=0)                    # (E+8, HIDDEN)

    # constant attention masks, hoisted out of the kernel
    h_ids = jnp.arange(HT) // TOK                   # head of packed row
    t_ids = jnp.arange(HT) % TOK                    # token of packed row
    e_ids = jnp.arange(EMBED) // HEAD_DIM           # head of each lane
    head_mask = (h_ids[:, None] == e_ids[None, :]).astype(jnp.float32)   # (HT, E)
    same_head = h_ids[:, None] == h_ids[None, :]
    same_batch = (t_ids[:, None] // L) == (t_ids[None, :] // L)
    attn_bias = jnp.where(same_head & same_batch, 0.0, NEG_BIG).astype(jnp.float32)  # (HT, HT)

    packed = (w_qkvo, w1b, W2.T, head_mask, attn_bias)
    return raw, packed


if __name__ == "__main__":
    rng = jax.random.PRNGKey(0)
    k_v, k_k, k_q, k_p = jax.random.split(rng, 4)
    value = jax.random.normal(k_v, (N, L, EMBED), jnp.float32)
    key = jax.random.normal(k_k, (N, L, EMBED), jnp.float32)
    query = jax.random.normal(k_q, (N, L, EMBED), jnp.float32)

    raw_params, packed_params = make_params(k_p)

    out = transformer_block(value, key, query, packed_params)
    out = jax.block_until_ready(out)

    ref = ref_transformer_block(value, key, query, raw_params)
    assert out.shape == (N, L, EMBED)
    assert jnp.allclose(out, ref, atol=1e-4, rtol=1e-4), (
        f"max abs err {jnp.max(jnp.abs(out - ref))}")
    print("KERNEL_OK")
</pallas_src>

<mosaic_0001>
module attributes {stable_mosaic.version = 11 : i64} {
  func.func @transformer_block_kernel(%arg0: memref<16x32xf32, #tpu.memory_space<vmem>>, %arg1: memref<16x32xf32, #tpu.memory_space<vmem>>, %arg2: memref<16x32xf32, #tpu.memory_space<vmem>>, %arg3: memref<128x32xf32, #tpu.memory_space<vmem>>, %arg4: memref<40x128xf32, #tpu.memory_space<vmem>>, %arg5: memref<128x32xf32, #tpu.memory_space<vmem>>, %arg6: memref<64x32xf32, #tpu.memory_space<vmem>>, %arg7: memref<64x64xf32, #tpu.memory_space<vmem>>, %arg8: memref<16x32xf32, #tpu.memory_space<vmem>>) attributes {dimension_semantics = [], scalar_prefetch = 0 : i64, scratch_operands = 0 : i64, tpu.core_type = #tpu.core_type<tc>} {
    %c0 = arith.constant 0 : index
    %c0_0 = arith.constant 0 : index
    %0 = vector.load %arg0[%c0, %c0_0] : memref<16x32xf32, #tpu.memory_space<vmem>>, vector<16x32xf32>
    %c0_1 = arith.constant 0 : index
    %c0_2 = arith.constant 0 : index
    %1 = vector.load %arg1[%c0_1, %c0_2] : memref<16x32xf32, #tpu.memory_space<vmem>>, vector<16x32xf32>
    %c0_3 = arith.constant 0 : index
    %c0_4 = arith.constant 0 : index
    %2 = vector.load %arg2[%c0_3, %c0_4] : memref<16x32xf32, #tpu.memory_space<vmem>>, vector<16x32xf32>
    %c0_5 = arith.constant 0 : index
    %c0_6 = arith.constant 0 : index
    %3 = vector.load %arg3[%c0_5, %c0_6] : memref<128x32xf32, #tpu.memory_space<vmem>>, vector<32x32xf32>
    %cst = arith.constant dense<0.000000e+00> : vector<16x32xf32>
    %4 = tpu.matmul %0, %3, %cst {dimension_numbers = #tpu.dot_dimension_numbers<[1], [0], [0], [1], [0, 0, 1, 1], [], []>} : vector<16x32xf32>, vector<32x32xf32>, vector<16x32xf32> -> vector<16x32xf32>
    %c32 = arith.constant 32 : index
    %c0_7 = arith.constant 0 : index
    %5 = vector.load %arg3[%c32, %c0_7] : memref<128x32xf32, #tpu.memory_space<vmem>>, vector<32x32xf32>
    %cst_8 = arith.constant dense<0.000000e+00> : vector<16x32xf32>
    %6 = tpu.matmul %1, %5, %cst_8 {dimension_numbers = #tpu.dot_dimension_numbers<[1], [0], [0], [1], [0, 0, 1, 1], [], []>} : vector<16x32xf32>, vector<32x32xf32>, vector<16x32xf32> -> vector<16x32xf32>
    %c64 = arith.constant 64 : index
    %c0_9 = arith.constant 0 : index
    %7 = vector.load %arg3[%c64, %c0_9] : memref<128x32xf32, #tpu.memory_space<vmem>>, vector<32x32xf32>
    %cst_10 = arith.constant dense<0.000000e+00> : vector<16x32xf32>
    %8 = tpu.matmul %2, %7, %cst_10 {dimension_numbers = #tpu.dot_dimension_numbers<[1], [0], [0], [1], [0, 0, 1, 1], [], []>} : vector<16x32xf32>, vector<32x32xf32>, vector<16x32xf32> -> vector<16x32xf32>
    %c0_11 = arith.constant 0 : index
    %c0_12 = arith.constant 0 : index
    %9 = vector.load %arg6[%c0_11, %c0_12] : memref<64x32xf32, #tpu.memory_space<vmem>>, vector<64x32xf32>
    %10 = tpu.concatenate %6, %6, %6, %6 in 0 : vector<16x32xf32>, vector<16x32xf32>, vector<16x32xf32>, vector<16x32xf32> -> vector<64x32xf32>
    %11 = arith.mulf %10, %9 : vector<64x32xf32>
    %12 = tpu.concatenate %4, %4, %4, %4 in 0 : vector<16x32xf32>, vector<16x32xf32>, vector<16x32xf32>, vector<16x32xf32> -> vector<64x32xf32>
    %13 = arith.mulf %12, %9 : vector<64x32xf32>
    %cst_13 = arith.constant dense<0.000000e+00> : vector<16x64xf32>
    %14 = tpu.matmul %8, %11, %cst_13 {dimension_numbers = #tpu.dot_dimension_numbers<[1], [1], [0], [0], [0, 0, 1, 0], [], []>} : vector<16x32xf32>, vector<64x32xf32>, vector<16x64xf32> -> vector<16x64xf32>
    %cst_14 = arith.constant 0.176776692 : f32
    %15 = vector.broadcast %cst_14 : f32 to vector<16x64xf32>
    %16 = arith.mulf %14, %15 : vector<16x64xf32>
    %17 = tpu.concatenate %16, %16, %16, %16 in 0 : vector<16x64xf32>, vector<16x64xf32>, vector<16x64xf32>, vector<16x64xf32> -> vector<64x64xf32>
    %c0_15 = arith.constant 0 : index
    %c0_16 = arith.constant 0 : index
    %18 = vector.load %arg7[%c0_15, %c0_16] : memref<64x64xf32, #tpu.memory_space<vmem>>, vector<64x64xf32>
    %19 = arith.addf %17, %18 : vector<64x64xf32>
    %cst_17 = arith.constant dense<0xFF800000> : vector<64xf32>
    %20 = vector.multi_reduction <maximumf>, %19, %cst_17 [1] : vector<64x64xf32> to vector<64xf32>
    %21 = vector.shape_cast %20 : vector<64xf32> to vector<64x1xf32>
    %22 = vector.broadcast %21 : vector<64x1xf32> to vector<64x64xf32>
    %23 = arith.subf %19, %22 : vector<64x64xf32>
    %24 = math.exp %23 : vector<64x64xf32>
    %cst_18 = arith.constant dense<0.000000e+00> : vector<64xf32>
    %25 = vector.multi_reduction <add>, %24, %cst_18 [1] : vector<64x64xf32> to vector<64xf32>
    %26 = vector.shape_cast %25 : vector<64xf32> to vector<64x1xf32>
    %27 = tpu.reciprocal %26 : vector<64x1xf32> -> vector<64x1xf32>
    %28 = vector.broadcast %27 : vector<64x1xf32> to vector<64x64xf32>
    %29 = arith.mulf %24, %28 : vector<64x64xf32>
    %cst_19 = arith.constant dense<0.000000e+00> : vector<64x32xf32>
    %30 = tpu.matmul %29, %13, %cst_19 {dimension_numbers = #tpu.dot_dimension_numbers<[1], [0], [0], [1], [0, 0, 1, 1], [], []>} : vector<64x64xf32>, vector<64x32xf32>, vector<64x32xf32> -> vector<64x32xf32>
    %31 = vector.extract_strided_slice %30 {offsets = [0, 0], sizes = [16, 32], strides = [1, 1]} : vector<64x32xf32> to vector<16x32xf32>
    %cst_20 = arith.constant 0.000000e+00 : f32
    %32 = vector.broadcast %cst_20 : f32 to vector<16x32xf32>
    %33 = arith.addf %32, %31 : vector<16x32xf32>
    %34 = vector.extract_strided_slice %30 {offsets = [16, 0], sizes = [16, 32], strides = [1, 1]} : vector<64x32xf32> to vector<16x32xf32>
    %35 = arith.addf %33, %34 : vector<16x32xf32>
    %36 = vector.extract_strided_slice %30 {offsets = [32, 0], sizes = [16, 32], strides = [1, 1]} : vector<64x32xf32> to vector<16x32xf32>
    %37 = arith.addf %35, %36 : vector<16x32xf32>
    %38 = vector.extract_strided_slice %30 {offsets = [48, 0], sizes = [16, 32], strides = [1, 1]} : vector<64x32xf32> to vector<16x32xf32>
    %39 = arith.addf %37, %38 : vector<16x32xf32>
    %c32_21 = arith.constant 32 : index
    %c0_22 = arith.constant 0 : index
    %40 = vector.load %arg4[%c32_21, %c0_22] : memref<40x128xf32, #tpu.memory_space<vmem>>, vector<1x32xf32>
    %c33 = arith.constant 33 : index
    %c0_23 = arith.constant 0 : index
    %41 = vector.load %arg4[%c33, %c0_23] : memref<40x128xf32, #tpu.memory_space<vmem>>, vector<1x32xf32>
    %c34 = arith.constant 34 : index
    %c0_24 = arith.constant 0 : index
    %42 = vector.load %arg4[%c34, %c0_24] : memref<40x128xf32, #tpu.memory_space<vmem>>, vector<1x32xf32>
    %c35 = arith.constant 35 : index
    %c0_25 = arith.constant 0 : index
    %43 = vector.load %arg4[%c35, %c0_25] : memref<40x128xf32, #tpu.memory_space<vmem>>, vector<1x128xf32>
    %c36 = arith.constant 36 : index
    %c0_26 = arith.constant 0 : index
    %44 = vector.load %arg4[%c36, %c0_26] : memref<40x128xf32, #tpu.memory_space<vmem>>, vector<1x32xf32>
    %c37 = arith.constant 37 : index
    %c0_27 = arith.constant 0 : index
    %45 = vector.load %arg4[%c37, %c0_27] : memref<40x128xf32, #tpu.memory_space<vmem>>, vector<1x32xf32>
    %c38 = arith.constant 38 : index
    %c0_28 = arith.constant 0 : index
    %46 = vector.load %arg4[%c38, %c0_28] : memref<40x128xf32, #tpu.memory_space<vmem>>, vector<1x32xf32>
    %c96 = arith.constant 96 : index
    %c0_29 = arith.constant 0 : index
    %47 = vector.load %arg3[%c96, %c0_29] : memref<128x32xf32, #tpu.memory_space<vmem>>, vector<32x32xf32>
    %cst_30 = arith.constant dense<0.000000e+00> : vector<16x32xf32>
    %48 = tpu.matmul %39, %47, %cst_30 {dimension_numbers = #tpu.dot_dimension_numbers<[1], [0], [0], [1], [0, 0, 1, 1], [], []>} : vector<16x32xf32>, vector<32x32xf32>, vector<16x32xf32> -> vector<16x32xf32>
    %49 = vector.broadcast %40 : vector<1x32xf32> to vector<16x32xf32>
    %50 = arith.addf %48, %49 : vector<16x32xf32>
    %51 = arith.addf %50, %2 : vector<16x32xf32>
    %cst_31 = arith.constant dense<0.000000e+00> : vector<16xf32>
    %52 = vector.multi_reduction <add>, %51, %cst_31 [1] : vector<16x32xf32> to vector<16xf32>
    %53 = vector.shape_cast %52 : vector<16xf32> to vector<16x1xf32>
    %54 = arith.mulf %51, %51 : vector<16x32xf32>
    %cst_32 = arith.constant dense<0.000000e+00> : vector<16xf32>
    %55 = vector.multi_reduction <add>, %54, %cst_32 [1] : vector<16x32xf32> to vector<16xf32>
    %56 = vector.shape_cast %55 : vector<16xf32> to vector<16x1xf32>
    %cst_33 = arith.constant 3.125000e-02 : f32
    %57 = vector.broadcast %cst_33 : f32 to vector<16x1xf32>
    %58 = arith.mulf %53, %57 : vector<16x1xf32>
    %cst_34 = arith.constant 3.125000e-02 : f32
    %59 = vector.broadcast %cst_34 : f32 to vector<16x1xf32>
    %60 = arith.mulf %56, %59 : vector<16x1xf32>
    %61 = arith.mulf %58, %58 : vector<16x1xf32>
    %62 = arith.subf %60, %61 : vector<16x1xf32>
    %63 = vector.broadcast %58 : vector<16x1xf32> to vector<16x32xf32>
    %64 = arith.subf %51, %63 : vector<16x32xf32>
    %cst_35 = arith.constant 9.99999974E-6 : f32
    %65 = vector.broadcast %cst_35 : f32 to vector<16x1xf32>
    %66 = arith.addf %62, %65 : vector<16x1xf32>
    %67 = math.rsqrt %66 : vector<16x1xf32>
    %68 = vector.broadcast %67 : vector<16x1xf32> to vector<16x32xf32>
    %69 = arith.mulf %64, %68 : vector<16x32xf32>
    %70 = vector.broadcast %41 : vector<1x32xf32> to vector<16x32xf32>
    %71 = arith.mulf %69, %70 : vector<16x32xf32>
    %72 = vector.broadcast %42 : vector<1x32xf32> to vector<16x32xf32>
    %73 = arith.addf %71, %72 : vector<16x32xf32>
    %c0_36 = arith.constant 0 : index
    %c0_37 = arith.constant 0 : index
    %74 = vector.load %arg4[%c0_36, %c0_37] : memref<40x128xf32, #tpu.memory_space<vmem>>, vector<32x128xf32>
    %cst_38 = arith.constant dense<0.000000e+00> : vector<16x128xf32>
    %75 = tpu.matmul %73, %74, %cst_38 {dimension_numbers = #tpu.dot_dimension_numbers<[1], [0], [0], [1], [0, 0, 1, 1], [], []>} : vector<16x32xf32>, vector<32x128xf32>, vector<16x128xf32> -> vector<16x128xf32>
    %76 = vector.broadcast %43 : vector<1x128xf32> to vector<16x128xf32>
    %77 = arith.addf %75, %76 : vector<16x128xf32>
    %cst_39 = arith.constant 0.000000e+00 : f32
    %78 = vector.broadcast %cst_39 : f32 to vector<16x128xf32>
    %79 = arith.maximumf %77, %78 : vector<16x128xf32>
    %c0_40 = arith.constant 0 : index
    %c0_41 = arith.constant 0 : index
    %80 = vector.load %arg5[%c0_40, %c0_41] : memref<128x32xf32, #tpu.memory_space<vmem>>, vector<128x32xf32>
    %cst_42 = arith.constant dense<0.000000e+00> : vector<16x32xf32>
    %81 = tpu.matmul %79, %80, %cst_42 {dimension_numbers = #tpu.dot_dimension_numbers<[1], [0], [0], [1], [0, 0, 1, 1], [], []>} : vector<16x128xf32>, vector<128x32xf32>, vector<16x32xf32> -> vector<16x32xf32>
    %82 = vector.broadcast %44 : vector<1x32xf32> to vector<16x32xf32>
    %83 = arith.addf %81, %82 : vector<16x32xf32>
    %84 = arith.addf %83, %73 : vector<16x32xf32>
    %cst_43 = arith.constant dense<0.000000e+00> : vector<16xf32>
    %85 = vector.multi_reduction <add>, %84, %cst_43 [1] : vector<16x32xf32> to vector<16xf32>
    %86 = vector.shape_cast %85 : vector<16xf32> to vector<16x1xf32>
    %87 = arith.mulf %84, %84 : vector<16x32xf32>
    %cst_44 = arith.constant dense<0.000000e+00> : vector<16xf32>
    %88 = vector.multi_reduction <add>, %87, %cst_44 [1] : vector<16x32xf32> to vector<16xf32>
    %89 = vector.shape_cast %88 : vector<16xf32> to vector<16x1xf32>
    %cst_45 = arith.constant 3.125000e-02 : f32
    %90 = vector.broadcast %cst_45 : f32 to vector<16x1xf32>
    %91 = arith.mulf %86, %90 : vector<16x1xf32>
    %cst_46 = arith.constant 3.125000e-02 : f32
    %92 = vector.broadcast %cst_46 : f32 to vector<16x1xf32>
    %93 = arith.mulf %89, %92 : vector<16x1xf32>
    %94 = arith.mulf %91, %91 : vector<16x1xf32>
    %95 = arith.subf %93, %94 : vector<16x1xf32>
    %96 = vector.broadcast %91 : vector<16x1xf32> to vector<16x32xf32>
    %97 = arith.subf %84, %96 : vector<16x32xf32>
    %cst_47 = arith.constant 9.99999974E-6 : f32
    %98 = vector.broadcast %cst_47 : f32 to vector<16x1xf32>
    %99 = arith.addf %95, %98 : vector<16x1xf32>
    %100 = math.rsqrt %99 : vector<16x1xf32>
    %101 = vector.broadcast %100 : vector<16x1xf32> to vector<16x32xf32>
    %102 = arith.mulf %97, %101 : vector<16x32xf32>
    %103 = vector.broadcast %45 : vector<1x32xf32> to vector<16x32xf32>
    %104 = arith.mulf %102, %103 : vector<16x32xf32>
    %105 = vector.broadcast %46 : vector<1x32xf32> to vector<16x32xf32>
    %106 = arith.addf %104, %105 : vector<16x32xf32>
    %c0_48 = arith.constant 0 : index
    %c0_49 = arith.constant 0 : index
    %107 = vector.load %arg8[%c0_48, %c0_49] : memref<16x32xf32, #tpu.memory_space<vmem>>, vector<16x32xf32>
    tpu.vector_store %arg8[%c0_48, %c0_49], %106 {strides = array<i32>} : memref<16x32xf32, #tpu.memory_space<vmem>>, vector<16x32xf32>,
    return
  }
}

</mosaic_0001>

<bundles_post_ra>
// kernel: transformer_block.1
= control target key start
LH: loop header
LB: loop body
LE: loop exit
PB: predicated region body
PF: predicated region fallthrough
CT: control target
= control target key end

     0   :  { %vm40_vm0 = vcmask 261120   ;;  %s1320_s0 = inlined_call_operand.vmem [shape: f32[16,32], index: 0, kind: input, shape index: {}]   ;;  %s1321_s1 = inlined_call_operand.vmem [shape: f32[16,32], index: 1, kind: input, shape index: {}]   ;;  %s1322_s2 = inlined_call_operand.vmem [shape: f32[16,32], index: 2, kind: input, shape index: {}]   ;;  %s1323_s3 = inlined_call_operand.vmem [shape: f32[128,32], index: 3, kind: input, shape index: {}]   ;;  %s1324_s4 = inlined_call_operand.vmem [shape: f32[40,128], index: 4, kind: input, shape index: {}]   ;;  %s1325_s5 = inlined_call_operand.vmem [shape: f32[128,32], index: 5, kind: input, shape index: {}]   ;;  %s1326_s6 = inlined_call_operand.vmem [shape: f32[64,32], index: 6, kind: input, shape index: {}]   ;;  %s1327_s7 = inlined_call_operand.vmem [shape: f32[64,64], index: 7, kind: input, shape index: {}]   ;;  %s1328_s8 = inlined_call_operand.hbm [shape: f32[16,32], index: 8, kind: output, shape index: {}]  }
   0x1   :  { %v73_v0 = vld [vmem:[%s1323_s3 + $0x38] sm:$0xff]  ;;  %v72_v1 = vld [vmem:[%s1323_s3 + $0x30] sm:$0xff]  ;;  %v71_v2 = vld [vmem:[%s1323_s3 + $0x28] sm:$0xff] }
   0x2   :  { %92 = vmatpush.msra.mxu3 %v73_v0  ;;  %v106_v3 = vld [vmem:[%s1323_s3 + $0x58] sm:$0xff]  ;;  %v105_v4 = vld [vmem:[%s1323_s3 + $0x50] sm:$0xff]  ;;  %v70_v5 = vld [vmem:[%s1323_s3 + $0x20] sm:$0xff] }
   0x3   :  { %v32_v6 = vld [vmem:[%s1321_s1] sm:$0xff]  ;;  %125 = vmatpush.msra.mxu2 %v106_v3  ;;  %v104_v7 = vld [vmem:[%s1323_s3 + $0x48] sm:$0xff] }
   0x4   :  { %93 = vmatpush.msra.mxu3 %v72_v1  ;;  %v103_v8 = vld [vmem:[%s1323_s3 + $0x40] sm:$0xff] }
   0x5   :  { %126 = vmatpush.msra.mxu2 %v105_v4 }
   0x6   :  { %94 = vmatpush.msra.mxu3 %v71_v2 }
   0x7   :  { %13 = vsyncpa [#allocation3], 0  ;;  %127 = vmatpush.msra.mxu2 %v104_v7  ;;  %v936_v9 = vld [vmem:[%s1322_s2] sm:$0xff]  ;;  %v33_v10 = vld [vmem:[%s1321_s1 + $0x8] sm:$0xff]  ;;  %vm231_vm1 = vcmask 523264   ;;  %s858_s26 = smov [#allocation2]  }
   0x8   :  { %95 = vmatpush.msra.mxu3 %v70_v5  ;;  %v947_v11 = vld [vmem:[%s1322_s2 + $0x8] sm:$0xff]  ;;  %v955_v13 = vld [vmem:[%s1326_s6 + $0x38] sm:$0xff]  ;;  %v961_v16 = vld [vmem:[%s1326_s6 + $0x30] sm:$0xff]  ;;  %s732_s27 = sshll.u32 %s858_s26, 4  ;;  %s734_s29 = sshll.u32 %s1328_s8, 4  ;;  %s733_s27 = int_to_ptr.vmem [resolvable:$true] %s732_s27  ;;  %s735_s29 = int_to_ptr.hbm [resolvable:$true] %s734_s29 }
   0x9   :  { %748 = vmatmul.msk.f32.vlgmr.msra.gmra.mxu3 %vm40_vm0, %v32_v6  ;;  %128 = vmatpush.msra.mxu2 %v103_v8  ;;  %v968_v18 = vld [vmem:[%s1326_s6 + $0x28] sm:$0xff]  ;;  %v975_v20 = vld [vmem:[%s1326_s6 + $0x20] sm:$0xff]  ;;  %v982_v22 = vld [vmem:[%s1326_s6 + $0x18] sm:$0xff]  ;;  %s860_s30 = smov 8  }
   0xa   :  { %750 = vmatmul.msk.f32.vlgmr.msra.gmra.mxu2 %vm40_vm0, %v936_v9  ;;  %v989_v24 = vld [vmem:[%s1326_s6 + $0x10] sm:$0xff]  ;;  %v996_v26 = vld [vmem:[%s1326_s6 + $0x8] sm:$0xff]  ;;  %v1003_v28 = vld [vmem:[%s1326_s6] sm:$0xff] }
   0xb   :  { %v39_v32 = vld [vmem:[%s1323_s3 + $0x18] sm:$0xff]  ;;  %v38_v33 = vld [vmem:[%s1323_s3 + $0x10] sm:$0xff]  ;;  %v37_v34 = vld [vmem:[%s1323_s3 + $0x8] sm:$0xff] }
   0xc   :  { %59 = vmatpush.msra.mxu0 %v39_v32  ;;  %v36_v35 = vld [vmem:[%s1323_s3] sm:$0xff]  ;;  %v217_v38 = vld [vmem:[%s1327_s7 + $0x10] sm:$0xff]  ;;  %v31_v43 = vld [vmem:[%s1320_s0 + $0x8] sm:$0xff] }
   0xd   :  { %v30_v36 = vld [vmem:[%s1320_s0] sm:$0xff]  ;;  %v220_v47 = vld [vmem:[%s1327_s7 + $0x28] sm:$0xff]  ;;  %v218_v48 = vld [vmem:[%s1327_s7 + $0x18] sm:$0xff] }
   0xe   :  { %60 = vmatpush.msra.mxu0 %v38_v33  ;;  %v215_v39 = vld [vmem:[%s1327_s7] sm:$0xff]  ;;  %v216_v49 = vld [vmem:[%s1327_s7 + $0x8] sm:$0xff]  ;;  %v222_v57 = vld [vmem:[%s1327_s7 + $0x38] sm:$0xff] }
   0xf   :  { %v221_v58 = vld [vmem:[%s1327_s7 + $0x30] sm:$0xff]  ;;  %v219_v59 = vld [vmem:[%s1327_s7 + $0x20] sm:$0xff] }
  0x10   :  { %61 = vmatpush.msra.mxu0 %v37_v34 }
  0x11   :  { %749 = vmatmul.msk.f32.gmra.mxu3 %vm40_vm0, %v33_v10 }
  0x12   :  { %751 = vmatmul.msk.f32.gmra.mxu2 %vm40_vm0, %v947_v11  ;;  %62 = vmatpush.msra.mxu0 %v36_v35 }
  0x13   :  { %746 = vmatmul.msk.f32.vlgmr.msra.gmra.mxu0 %vm40_vm0, %v30_v36 }
  0x1b   :  { %747 = vmatmul.msk.f32.gmra.mxu0 %vm40_vm0, %v31_v43 }
  0x8c   :  { %v97_v12 = vpop.f32.mrf.mxu3 }
  0x8d   :  { %v150_v17 = vmul.f32 %v961_v16, %v97_v12  ;;  %v148_v21 = vmul.f32 %v975_v20, %v97_v12  ;;  %v146_v25 = vmul.f32 %v989_v24, %v97_v12  ;;  %v144_v29 = vmul.f32 %v1003_v28, %v97_v12  ;;  %v130_v30 = vpop.f32.mrf.mxu2 }
  0x90   :  { %v64_v8 = vpop.f32.mrf.mxu0 }
  0x91   :  { %v158_v34 = vmul.f32 %v961_v16, %v64_v8 }
  0x94   :  { %v100_v14 = vpop.f32.mrf.mxu3 }
  0x95   :  { %v151_v15 = vmul.f32 %v955_v13, %v100_v14  ;;  %v149_v19 = vmul.f32 %v968_v18, %v100_v14  ;;  %v147_v23 = vmul.f32 %v982_v22, %v100_v14  ;;  %v145_v27 = vmul.f32 %v996_v26, %v100_v14  ;;  %v133_v31 = vpop.f32.mrf.mxu2 }
  0x97   :  { %752 = vmatpush.xpose.msk.msrb.mxu3 %vm40_vm0, %v151_v15 }
  0x9b   :  { %753 = vmatpush.xpose.msk.msrb.mxu3 %vm40_vm0, %v150_v17 }
  0x9f   :  { %754 = vmatpush.xpose.msk.msrb.mxu3 %vm40_vm0, %v149_v19 }
  0xa3   :  { %755 = vmatpush.xpose.msk.msrb.mxu3 %vm40_vm0, %v148_v21 }
  0xa7   :  { %756 = vmatpush.xpose.msk.msrb.mxu3 %vm40_vm0, %v147_v23 }
  0xab   :  { %757 = vmatpush.xpose.msk.msrb.mxu3 %vm40_vm0, %v146_v25 }
  0xaf   :  { %758 = vmatpush.xpose.msk.msrb.mxu3 %vm40_vm0, %v145_v27 }
  0xb3   :  { %759 = vmatpush.xpose.msk.msrb.mxu3 %vm40_vm0, %v144_v29 }
  0xb6   :  { %760 = vmatmul.msk.f32.vlgmr.msrb.gmra.mxu3 %vm40_vm0, %v130_v30 }
  0xbe   :  { %761 = vmatmul.msk.f32.gmra.mxu3 %vm40_vm0, %v133_v31  ;;  %v67_v31 = vpop.f32.mrf.mxu0 }
  0xbf   :  { %v159_v33 = vmul.f32 %v955_v13, %v67_v31  ;;  %v156_v13 = vmul.f32 %v975_v20, %v64_v8 }
  0xc1   :  { %456 = vmatpush.msrb.mxu0 %v159_v33  ;;  %774 = vmatpush.msrb.mxu2 %v159_v33 }
  0xc3   :  { %457 = vmatpush.msrb.mxu0 %v158_v34  ;;  %775 = vmatpush.msrb.mxu2 %v158_v34 }
 0x139   :  { %v207_v37 = vpop.f32.mrf.mxu3 }
 0x13a   :  { %v213_v40 = vmul.f32 0.17677669, %v207_v37 }
 0x13c   :  { %v225_v41 = vadd.f32 %v217_v38, %v213_v40  ;;  %v223_v42 = vadd.f32 %v215_v39, %v213_v40  ;;  %v229_v61 = vadd.f32 %v221_v58, %v213_v40  ;;  %v227_v62 = vadd.f32 %v219_v59, %v213_v40 }
 0x13d   :  { %v157_v40 = vmul.f32 %v968_v18, %v67_v31 }
 0x13e   :  { %v238_v44 = vsel %vm231_vm1, %v225_v41, -inf  ;;  %v232_v45 = vsel %vm231_vm1, %v223_v42, -inf  ;;  %v250_v0 = vsel %vm231_vm1, %v229_v61, -inf  ;;  %v244_v1 = vsel %vm231_vm1, %v227_v62, -inf }
 0x13f   :  { %239 = vmax.xlane.f32.xlu1 %v238_v44  ;;  %233 = vmax.xlane.f32.xlu0 %v232_v45 }
 0x140   :  { %458 = vmatpush.msrb.mxu0 %v157_v40  ;;  %776 = vmatpush.msrb.mxu2 %v157_v40 }
 0x141   :  { %v210_v46 = vpop.f32.mrf.mxu3 }
 0x142   :  { %v214_v50 = vmul.f32 0.17677669, %v210_v46  ;;  %v155_v46 = vmul.f32 %v982_v22, %v67_v31  ;;  %459 = vmatpush.msrb.mxu0 %v156_v13  ;;  %777 = vmatpush.msrb.mxu2 %v156_v13 }
 0x144   :  { %v228_v51 = vadd.f32 %v220_v47, %v214_v50  ;;  %v226_v52 = vadd.f32 %v218_v48, %v214_v50  ;;  %v224_v53 = vadd.f32 %v216_v49, %v214_v50  ;;  %v1059_v60 = vadd.f32 %v222_v57, %v214_v50  ;;  %460 = vmatpush.msrb.mxu0 %v155_v46 }
 0x145   :  { %v154_v47 = vmul.f32 %v989_v24, %v64_v8  ;;  %v153_v48 = vmul.f32 %v996_v26, %v67_v31  ;;  %778 = vmatpush.msrb.mxu2 %v155_v46 }
 0x146   :  { %v247_v54 = vsel %vm231_vm1, %v228_v51, -inf  ;;  %v241_v55 = vsel %vm231_vm1, %v226_v52, -inf  ;;  %v235_v56 = vsel %vm231_vm1, %v224_v53, -inf  ;;  %v253_v63 = vsel %vm231_vm1, %v1059_v60, -inf }
 0x147   :  { %248 = vmax.xlane.f32.xlu1 %v247_v54  ;;  %242 = vmax.xlane.f32.xlu2 %v241_v55 }
 0x148   :  { %236 = vmax.xlane.f32.xlu0 %v235_v56  ;;  %461 = vmatpush.msrb.mxu0 %v154_v47 }
 0x149   :  { %779 = vmatpush.msrb.mxu2 %v154_v47 }
 0x14a   :  { %462 = vmatpush.msrb.mxu0 %v153_v48 }
 0x14b   :  { %780 = vmatpush.msrb.mxu2 %v153_v48 }
 0x14f   :  { %254 = vmax.xlane.f32.xlu1 %v253_v63  ;;  %251 = vmax.xlane.f32.xlu2 %v250_v0 }
 0x150   :  { %245 = vmax.xlane.f32.xlu0 %v244_v1 }
 0x1b2   :  { %v240_v2 = vpop.xlane.xlu1 %239  ;;  %v234_v3 = vpop.xlane.xlu0 %233 }
 0x1b3   :  { %v258_v4 = vsub.f32 %v225_v41, %v240_v2  ;;  %v256_v5 = vsub.f32 %v223_v42, %v234_v3 }
 0x1b5   :  { %v268_v6 = vmul.f32 1.442695, %v258_v4  ;;  %v264_v7 = vmul.f32 1.442695, %v256_v5 }
 0x1b7   :  { %792 = vpow2.f32 %v268_v6 }
 0x1b8   :  { %794 = vpow2.f32 %v264_v7 }
 0x1ba   :  { %v249_v10 = vpop.xlane.xlu1 %248  ;;  %v243_v12 = vpop.xlane.xlu2 %242 }
 0x1bb   :  { %v261_v14 = vsub.f32 %v228_v51, %v249_v10  ;;  %v237_v15 = vpop.xlane.xlu0 %236  ;;  %v259_v29 = vsub.f32 %v226_v52, %v243_v12  ;;  %v152_v51 = vmul.f32 %v1003_v28, %v64_v8 }
 0x1bc   :  { %v257_v17 = vsub.f32 %v224_v53, %v237_v15 }
 0x1bd   :  { %v1065_v19 = vpop.eup %792  ;;  %v274_v21 = vmul.f32 1.442695, %v261_v14  ;;  %v270_v35 = vmul.f32 1.442695, %v259_v29  ;;  %463 = vmatpush.msrb.mxu0 %v152_v51  ;;  %781 = vmatpush.msrb.mxu2 %v152_v51 }
 0x1be   :  { %v1067_v23 = vpop.eup %794  ;;  %v266_v25 = vmul.f32 1.442695, %v257_v17  ;;  %v286_v27 = vsel %vm231_vm1, %v1065_v19, 0.0 }
 0x1bf   :  { %796 = vpow2.f32 %v274_v21  ;;  %287 = vadd.xlane.f32.xlu1 %v286_v27  ;;  %v280_v30 = vsel %vm231_vm1, %v1067_v23, 0.0 }
 0x1c0   :  { %281 = vadd.xlane.f32.xlu2 %v280_v30  ;;  %798 = vpow2.f32 %v266_v25 }
 0x1c1   :  { %800 = vpow2.f32 %v270_v35 }
 0x1c2   :  { %v252_v32 = vpop.xlane.xlu2 %251  ;;  %v255_v38 = vpop.xlane.xlu1 %254 }
 0x1c3   :  { %v262_v36 = vsub.f32 %v229_v61, %v252_v32  ;;  %v246_v37 = vpop.xlane.xlu0 %245  ;;  %v263_v45 = vsub.f32 %v1059_v60, %v255_v38 }
 0x1c4   :  { %v260_v39 = vsub.f32 %v227_v62, %v246_v37 }
 0x1c5   :  { %v1076_v41 = vpop.eup %796  ;;  %v276_v42 = vmul.f32 1.442695, %v262_v36  ;;  %v278_v20 = vmul.f32 1.442695, %v263_v45 }
 0x1c6   :  { %v272_v43 = vmul.f32 1.442695, %v260_v39  ;;  %v295_v44 = vsel %vm231_vm1, %v1076_v41, 0.0  ;;  %v1081_v16 = vpop.eup %798 }
 0x1c7   :  { %802 = vpow2.f32 %v276_v42  ;;  %v283_v18 = vsel %vm231_vm1, %v1081_v16, 0.0  ;;  %v1089_v49 = vpop.eup %800 }
 0x1c8   :  { %296 = vadd.xlane.f32.xlu2 %v295_v44  ;;  %804 = vpow2.f32 %v272_v43  ;;  %284 = vadd.xlane.f32.xlu0 %v283_v18  ;;  %v289_v24 = vsel %vm231_vm1, %v1089_v49, 0.0 }
 0x1c9   :  { %806 = vpow2.f32 %v278_v20 }
 0x1cd   :  { %v1091_v50 = vpop.eup %802 }
 0x1ce   :  { %v1094_v22 = vpop.eup %804  ;;  %v298_v52 = vsel %vm231_vm1, %v1091_v50, 0.0 }
 0x1cf   :  { %299 = vadd.xlane.f32.xlu1 %v298_v52  ;;  %v292_v26 = vsel %vm231_vm1, %v1094_v22, 0.0  ;;  %v1102_v28 = vpop.eup %806 }
 0x1d0   :  { %290 = vadd.xlane.f32.xlu0 %v289_v24  ;;  %293 = vadd.xlane.f32.xlu2 %v292_v26  ;;  %v301_v53 = vsel %vm231_vm1, %v1102_v28, 0.0 }
 0x1d8   :  { %302 = vadd.xlane.f32.xlu0 %v301_v53 }
 0x232   :  { %v1106_v55 = vpop.xlane.xlu1 %287 }
 0x233   :  { %v282_v54 = vpop.xlane.xlu2 %281  ;;  %v343_v8 = vand.u32 2147483648, %v1106_v55  ;;  %vm337_vm6 = vweird.f32 %v1106_v55 }
 0x234   :  { %808 = vrcp.f32 %v282_v54  ;;  %v313_v1 = vand.u32 2147483647, %v282_v54  ;;  %v315_v2 = vand.u32 2147483648, %v282_v54  ;;  %vm309_vm3 = vweird.f32 %v282_v54 }
 0x235   :  { %810 = vrcp.f32 %v1106_v55 }
 0x236   :  { %vm314_vm5 = vcmp.eq.f32.partialorder %v313_v1, 8.507059e+37  ;;  %v316_v17 = vor.u32 1.1754944e-38, %v315_v2 }
 0x23a   :  { %v809_v56 = vpop.eup %808 }
 0x23b   :  { %v305_v57 = vmul.f32 %v809_v56, %v282_v54  ;;  %v297_v58 = vpop.xlane.xlu2 %296  ;;  %v285_v59 = vpop.xlane.xlu0 %284  ;;  %vm310_vm2 = vweird.f32 %v809_v56 }
 0x23c   :  { %812 = vrcp.f32 %v297_v58  ;;  %v1109_v61 = vpop.eup %810  ;;  %vm1113_vm4 = vmor %vm309_vm3, %vm310_vm2  ;;  %v383_v25 = vand.u32 2147483647, %v297_v58  ;;  %v385_v27 = vand.u32 2147483648, %v297_v58  ;;  %v329_v32 = vand.u32 2147483648, %v285_v59 }
 0x23d   :  { %v306_v60 = vsub.f32 1.0, %v305_v57  ;;  %814 = vrcp.f32 %v285_v59  ;;  %v333_v63 = vmul.f32 %v1109_v61, %v1106_v55  ;;  %v327_v36 = vand.u32 2147483647, %v285_v59 }
 0x23e   :  { %vm379_vm9 = vweird.f32 %v297_v58  ;;  %v386_v42 = vor.u32 1.1754944e-38, %v385_v27  ;;  %vm323_vm11 = vweird.f32 %v285_v59  ;;  %vm384_vm12 = vcmp.eq.f32.partialorder %v383_v25, 8.507059e+37 }
 0x23f   :  { %v307_v62 = vmul.f32 %v809_v56, %v306_v60  ;;  %v334_v15 = vsub.f32 1.0, %v333_v63  ;;  %vm338_vm14 = vweird.f32 %v1109_v61  ;;  %v330_v18 = vor.u32 1.1754944e-38, %v329_v32 }
 0x240   :  { %vm328_vm15 = vcmp.eq.f32.partialorder %v327_v36, 8.507059e+37  ;;  %vm1159_vm3 = vmor %vm337_vm6, %vm338_vm14 }
 0x241   :  { %v308_v0 = vadd.f32 %v809_v56, %v307_v62  ;;  %v335_v37 = vmul.f32 %v1109_v61, %v334_v15 }
 0x242   :  { %v813_v3 = vpop.eup %812  ;;  %v1117_v7 = vpop.xlane.xlu1 %299 }
 0x243   :  { %v815_v4 = vpop.eup %814  ;;  %v375_v6 = vmul.f32 %v813_v3, %v297_v58  ;;  %816 = vrcp.f32 %v1117_v7  ;;  %v1121_v12 = vpop.xlane.xlu0 %290  ;;  %v312_v14 = vsel %vm1113_vm4, %v809_v56, %v308_v0  ;;  %vm380_vm7 = vweird.f32 %v813_v3 }
 0x244   :  { %v319_v10 = vmul.f32 %v815_v4, %v285_v59  ;;  %v1125_v30 = vpop.xlane.xlu2 %293  ;;  %818 = vrcp.f32 %v1121_v12  ;;  %v317_v33 = vsel %vm314_vm5, %v316_v17, %v312_v14  ;;  %vm324_vm8 = vweird.f32 %v815_v4  ;;  %vm1132_vm10 = vmor %vm379_vm9, %vm380_vm7 }
 0x245   :  { %v376_v21 = vsub.f32 1.0, %v375_v6  ;;  %v416_v35 = vmul.f32 %v1067_v23, %v317_v33  ;;  %820 = vrcp.f32 %v1125_v30  ;;  %v341_v23 = vand.u32 2147483647, %v1106_v55  ;;  %vm325_vm13 = vmor %vm323_vm11, %vm324_vm8 }
 0x246   :  { %v320_v29 = vsub.f32 1.0, %v319_v10  ;;  %v336_v52 = vadd.f32 %v1109_v61, %v335_v37  ;;  %v399_v24 = vand.u32 2147483648, %v1117_v7  ;;  %v397_v54 = vand.u32 2147483647, %v1117_v7 }
 0x247   :  { %v377_v31 = vmul.f32 %v813_v3, %v376_v21  ;;  %762 = vmatmul.msk.f32.vlgmr.msrb.gmra.mxu0 %vm231_vm1, %v416_v35  ;;  %vm393_vm4 = vweird.f32 %v1117_v7  ;;  %vm342_vm6 = vcmp.eq.f32.partialorder %v341_v23, 8.507059e+37  ;;  %vm351_vm9 = vweird.f32 %v1121_v12  ;;  %v505_v23 = vld [vmem:[%s1323_s3 + $0x68] sm:$0xff] }
 0x248   :  { %v321_v34 = vmul.f32 %v815_v4, %v320_v29  ;;  %v400_v63 = vor.u32 1.1754944e-38, %v399_v24  ;;  %vm398_vm7 = vcmp.eq.f32.partialorder %v397_v54, 8.507059e+37  ;;  %v357_v10 = vand.u32 2147483648, %v1121_v12  ;;  %v785_v54 = vld [vmem:[%s1324_s4 + $0x20] ss:$0 sm:$0xff] }
 0x249   :  { %v378_v38 = vadd.f32 %v813_v3, %v377_v31  ;;  %v817_v39 = vpop.eup %816  ;;  %v355_v21 = vand.u32 2147483647, %v1121_v12  ;;  %v371_v36 = vand.u32 2147483648, %v1125_v30 }
 0x24a   :  { %v322_v43 = vadd.f32 %v815_v4, %v321_v34  ;;  %v389_v44 = vmul.f32 %v817_v39, %v1117_v7  ;;  %v1143_v45 = vpop.eup %818  ;;  %vm394_vm2 = vweird.f32 %v817_v39  ;;  %v358_v31 = vor.u32 1.1754944e-38, %v357_v10 }
 0x24b   :  { %v382_v13 = vsel %vm1132_vm10, %v813_v3, %v378_v38  ;;  %v303_v46 = vpop.xlane.xlu0 %302  ;;  %v347_v51 = vmul.f32 %v1143_v45, %v1121_v12  ;;  %v1151_v56 = vpop.eup %820  ;;  %vm395_vm5 = vmor %vm393_vm4, %vm394_vm2  ;;  %vm352_vm8 = vweird.f32 %v1143_v45  ;;  %vm356_vm14 = vcmp.eq.f32.partialorder %v355_v21, 8.507059e+37  ;;  %v644_v21 = vld [vmem:[%s1325_s5 + $0x70] sm:$0xff] }
 0x24c   :  { %v326_v47 = vsel %vm325_vm13, %v815_v4, %v322_v43  ;;  %v387_v20 = vsel %vm384_vm12, %v386_v42, %v382_v13  ;;  %v390_v48 = vsub.f32 1.0, %v389_v44  ;;  %822 = vrcp.f32 %v303_v46  ;;  %vm353_vm11 = vmor %vm351_vm9, %vm352_vm8 }
 0x24d   :  { %v331_v26 = vsel %vm328_vm15, %v330_v18, %v326_v47  ;;  %v421_v53 = vmul.f32 %v1076_v41, %v387_v20  ;;  %v348_v58 = vsub.f32 1.0, %v347_v51  ;;  %v340_v41 = vsel %vm1159_vm3, %v1109_v61, %v336_v52 }
 0x24e   :  { %v391_v57 = vmul.f32 %v817_v39, %v390_v48  ;;  %v417_v59 = vmul.f32 %v1081_v16, %v331_v26  ;;  %v344_v16 = vor.u32 1.1754944e-38, %v343_v8  ;;  %v361_v0 = vmul.f32 %v1151_v56, %v1125_v30 }
 0x24f   :  { %767 = vmatmul.msk.f32.vlgmr.msrb.gmra.mxu2 %vm231_vm1, %v421_v53  ;;  %v349_v1 = vmul.f32 %v1143_v45, %v348_v58  ;;  %v413_v14 = vand.u32 2147483648, %v303_v46  ;;  %vm407_vm12 = vweird.f32 %v303_v46  ;;  %vm366_vm2 = vweird.f32 %v1151_v56 }
 0x250   :  { %v392_v62 = vadd.f32 %v817_v39, %v391_v57  ;;  %763 = vmatmul.msk.f32.gmra.mxu0 %vm231_vm1, %v417_v59  ;;  %v345_v5 = vsel %vm342_vm6, %v344_v16, %v340_v41  ;;  %v362_v55 = vsub.f32 1.0, %v361_v0  ;;  %vm365_vm3 = vweird.f32 %v1125_v30 }
 0x251   :  { %v350_v8 = vadd.f32 %v1143_v45, %v349_v1  ;;  %v418_v15 = vmul.f32 %v1065_v19, %v345_v5  ;;  %v414_v32 = vor.u32 1.1754944e-38, %v413_v14  ;;  %v369_v38 = vand.u32 2147483647, %v1125_v30  ;;  %vm367_vm4 = vmor %vm365_vm3, %vm366_vm2  ;;  %v506_v30 = vld [vmem:[%s1323_s3 + $0x70] sm:$0xff] }
 0x252   :  { %v823_v2 = vpop.eup %822  ;;  %v396_v3 = vsel %vm395_vm5, %v817_v39, %v392_v62  ;;  %v363_v25 = vmul.f32 %v1151_v56, %v362_v55 }
 0x253   :  { %v403_v4 = vmul.f32 %v823_v2, %v303_v46  ;;  %v401_v61 = vsel %vm398_vm7, %v400_v63, %v396_v3  ;;  %vm408_vm10 = vweird.f32 %v823_v2  ;;  %v354_v27 = vsel %vm353_vm11, %v1143_v45, %v350_v8 }
 0x254   :  { %v422_v6 = vmul.f32 %v1091_v50, %v401_v61  ;;  %v411_v50 = vand.u32 2147483647, %v303_v46  ;;  %vm409_vm13 = vmor %vm407_vm12, %vm408_vm10  ;;  %v359_v33 = vsel %vm356_vm14, %v358_v31, %v354_v27  ;;  %v364_v35 = vadd.f32 %v1151_v56, %v363_v25 }
 0x255   :  { %v404_v7 = vsub.f32 1.0, %v403_v4  ;;  %v419_v37 = vmul.f32 %v1089_v49, %v359_v33  ;;  %vm370_vm5 = vcmp.eq.f32.partialorder %v369_v38, 8.507059e+37  ;;  %v507_v49 = vld [vmem:[%s1323_s3 + $0x78] sm:$0xff]  ;;  %v595_v4 = vld [vmem:[%s1324_s4 + $0x8] sm:$0xff] }
 0x256   :  { %vm412_vm15 = vcmp.eq.f32.partialorder %v411_v50, 8.507059e+37  ;;  %v368_v39 = vsel %vm367_vm4, %v1151_v56, %v364_v35  ;;  %527 = vmatpush.msra.mxu1 %v507_v49  ;;  %v640_v35 = vld [vmem:[%s1325_s5 + $0x50] sm:$0xff] }
 0x257   :  { %v405_v17 = vmul.f32 %v823_v2, %v404_v7  ;;  %768 = vmatmul.msk.f32.gmra.mxu2 %vm231_vm1, %v422_v6  ;;  %v594_v6 = vld [vmem:[%s1324_s4] sm:$0xff] }
 0x258   :  { %764 = vmatmul.msk.f32.gmra.mxu0 %vm231_vm1, %v418_v15  ;;  %528 = vmatpush.msra.mxu1 %v506_v30 }
 0x259   :  { %v406_v29 = vadd.f32 %v823_v2, %v405_v17  ;;  %v645_v17 = vld [vmem:[%s1325_s5 + $0x78] sm:$0xff] }
 0x25a   :  { %529 = vmatpush.msra.mxu1 %v505_v23  ;;  %v786_v23 = vld [vmem:[%s1324_s4 + $0x21] ss:$0 sm:$0xff] }
 0x25b   :  { %v410_v19 = vsel %vm409_vm13, %v823_v2, %v406_v29  ;;  %v597_v2 = vld [vmem:[%s1324_s4 + $0x18] sm:$0xff]  ;;  %v643_v29 = vld [vmem:[%s1325_s5 + $0x68] sm:$0xff] }
 0x25c   :  { %v415_v34 = vsel %vm412_vm15, %v414_v32, %v410_v19  ;;  %617 = vmatpush.msra.mxu2 %v597_v2  ;;  %v642_v32 = vld [vmem:[%s1325_s5 + $0x60] sm:$0xff] }
 0x25d   :  { %v423_v12 = vmul.f32 %v1102_v28, %v415_v34  ;;  %v372_v28 = vor.u32 1.1754944e-38, %v371_v36  ;;  %v641_v34 = vld [vmem:[%s1325_s5 + $0x58] sm:$0xff] }
 0x25f   :  { %769 = vmatmul.msk.f32.gmra.mxu2 %vm231_vm1, %v423_v12  ;;  %v373_v40 = vsel %vm370_vm5, %v372_v28, %v368_v39  ;;  %v638_v39 = vld [vmem:[%s1325_s5 + $0x40] sm:$0xff] }
 0x260   :  { %765 = vmatmul.msk.f32.gmra.mxu0 %vm231_vm1, %v419_v37  ;;  %v420_v42 = vmul.f32 %v1094_v22, %v373_v40  ;;  %v504_v22 = vld [vmem:[%s1323_s3 + $0x60] sm:$0xff]  ;;  %v639_v37 = vld [vmem:[%s1325_s5 + $0x48] sm:$0xff] }
 0x261   :  { %530 = vmatpush.msra.mxu1 %v504_v22  ;;  %v636_v22 = vld [vmem:[%s1325_s5 + $0x30] sm:$0xff] }
 0x263   :  { %647 = vmatpush.msrb.mxu1 %v645_v17 }
 0x265   :  { %648 = vmatpush.msrb.mxu1 %v644_v21 }
 0x267   :  { %649 = vmatpush.msrb.mxu1 %v643_v29 }
 0x268   :  { %766 = vmatmul.msk.f32.gmra.mxu0 %vm231_vm1, %v420_v42  ;;  %v637_v42 = vld [vmem:[%s1325_s5 + $0x38] sm:$0xff] }
 0x269   :  { %650 = vmatpush.msrb.mxu1 %v642_v32 }
 0x26b   :  { %651 = vmatpush.msrb.mxu1 %v641_v34 }
 0x26d   :  { %652 = vmatpush.msrb.mxu1 %v640_v35 }
 0x26f   :  { %653 = vmatpush.msrb.mxu1 %v639_v37 }
 0x271   :  { %654 = vmatpush.msrb.mxu1 %v638_v39 }
 0x273   :  { %655 = vmatpush.msrb.mxu1 %v637_v42 }
 0x275   :  { %656 = vmatpush.msrb.mxu1 %v636_v22  ;;  %v790_v22 = vld [vmem:[%s1324_s4 + $0x25] ss:$0 sm:$0xff] }
 0x2c4   :  { %v465_v43 = vpop.f32.mrf.mxu0 }
 0x2cd   :  { %v468_v44 = vpop.f32.mrf.mxu0 }
 0x2d2   :  { %v480_v45 = vpop.f32.mrf.mxu2 }
 0x2d5   :  { %v471_v13 = vpop.f32.mrf.mxu0 }
 0x2d6   :  { %v491_v47 = vadd.f32 %v471_v13, %v465_v43 }
 0x2da   :  { %v483_v46 = vpop.f32.mrf.mxu2 }
 0x2dd   :  { %v474_v18 = vpop.f32.mrf.mxu0 }
 0x2de   :  { %v492_v52 = vadd.f32 %v474_v18, %v468_v44  ;;  %v787_v18 = vld [vmem:[%s1324_s4 + $0x22] ss:$0 sm:$0xff] }
 0x2e0   :  { %v494_v26 = vadd.f32 %v492_v52, %v480_v45 }
 0x2e2   :  { %v486_v24 = vpop.f32.mrf.mxu2 }
 0x2e3   :  { %v496_v53 = vadd.f32 %v494_v26, %v486_v24  ;;  %v633_v24 = vld [vmem:[%s1325_s5 + $0x18] sm:$0xff] }
 0x2e5   :  { %v477_v20 = vpop.f32.mrf.mxu0 }
 0x2e6   :  { %v493_v48 = vadd.f32 %v491_v47, %v477_v20 }
 0x2e8   :  { %v495_v51 = vadd.f32 %v493_v48, %v483_v46  ;;  %v635_v46 = vld [vmem:[%s1325_s5 + $0x28] sm:$0xff]  ;;  %v634_v48 = vld [vmem:[%s1325_s5 + $0x20] sm:$0xff] }
 0x2e9   :  { %657 = vmatpush.msrb.mxu1 %v635_v46 }
 0x2ea   :  { %770 = vmatmul.msk.f32.vlgmr.msra.gmra.mxu1 %vm40_vm0, %v495_v51 }
 0x2eb   :  { %658 = vmatpush.msrb.mxu1 %v634_v48 }
 0x2ed   :  { %659 = vmatpush.msrb.mxu1 %v633_v24 }
 0x2f2   :  { %771 = vmatmul.msk.f32.gmra.mxu1 %vm40_vm0, %v496_v53 }
 0x367   :  { %v532_v56 = vpop.f32.mrf.mxu1 }
 0x368   :  { %v533_v57 = vadd.f32 %v785_v54, %v532_v56 }
 0x36a   :  { %v1214_v58 = vadd.f32 %v533_v57, %v936_v9 }
 0x36c   :  { %v540_v59 = vsel %vm40_vm0, %v1214_v58, 0.0  ;;  %v546_v60 = vmul.f32 %v1214_v58, %v1214_v58 }
 0x36d   :  { %541 = vadd.xlane.f32.xlu1 %v540_v59  ;;  %v632_v59 = vld [vmem:[%s1325_s5 + $0x10] sm:$0xff] }
 0x36e   :  { %v548_v41 = vsel %vm40_vm0, %v546_v60, 0.0  ;;  %v631_v60 = vld [vmem:[%s1325_s5 + $0x8] sm:$0xff]  ;;  %660 = vmatpush.msrb.mxu1 %v632_v59 }
 0x36f   :  { %v535_v62 = vpop.f32.mrf.mxu1  ;;  %549 = vadd.xlane.f32.xlu2 %v548_v41  ;;  %v630_v41 = vld [vmem:[%s1325_s5] sm:$0xff] }
 0x370   :  { %v536_v16 = vadd.f32 %v785_v54, %v535_v62  ;;  %661 = vmatpush.msrb.mxu1 %v631_v60  ;;  %v788_v62 = vld [vmem:[%s1324_s4 + $0x23] ss:$0 sm:$0xff] }
 0x372   :  { %v1222_v63 = vadd.f32 %v536_v16, %v947_v11  ;;  %v596_v11 = vld [vmem:[%s1324_s4 + $0x10] sm:$0xff]  ;;  %662 = vmatpush.msrb.mxu1 %v630_v41 }
 0x373   :  { %618 = vmatpush.msra.mxu2 %v596_v11 }
 0x374   :  { %v543_v0 = vsel %vm40_vm0, %v1222_v63, 0.0  ;;  %v547_v9 = vmul.f32 %v1222_v63, %v1222_v63 }
 0x375   :  { %544 = vadd.xlane.f32.xlu0 %v543_v0  ;;  %619 = vmatpush.msra.mxu2 %v595_v4 }
 0x376   :  { %v551_v1 = vsel %vm40_vm0, %v547_v9, 0.0 }
 0x377   :  { %552 = vadd.xlane.f32.xlu1 %v551_v1  ;;  %620 = vmatpush.msra.mxu2 %v594_v6 }
 0x3e0   :  { %v542_v3 = vpop.xlane.xlu1 %541 }
 0x3e1   :  { %v554_v5 = vmul.f32 0.03125, %v542_v3  ;;  %v789_v3 = vld [vmem:[%s1324_s4 + $0x24] ss:$0 sm:$0xff] }
 0x3e2   :  { %v550_v61 = vpop.xlane.xlu2 %549 }
 0x3e3   :  { %v558_v55 = vmul.f32 %v554_v5, %v554_v5  ;;  %v556_v7 = vmul.f32 0.03125, %v550_v61  ;;  %v562_v30 = vsub.f32 %v1214_v58, %v554_v5 }
 0x3e5   :  { %v560_v8 = vsub.f32 %v556_v7, %v558_v55 }
 0x3e7   :  { %v564_v10 = vadd.f32 1e-05, %v560_v8 }
 0x3e8   :  { %v545_v14 = vpop.xlane.xlu0 %544 }
 0x3e9   :  { %824 = vrsqrt.f32 %v564_v10  ;;  %v555_v15 = vmul.f32 0.03125, %v545_v14  ;;  %vm572_vm6 = vweird.f32 %v564_v10 }
 0x3ea   :  { %v553_v50 = vpop.xlane.xlu1 %552 }
 0x3eb   :  { %v559_v25 = vmul.f32 %v555_v15, %v555_v15  ;;  %v557_v27 = vmul.f32 0.03125, %v553_v50  ;;  %v563_v53 = vsub.f32 %v1222_v63, %v555_v15 }
 0x3ed   :  { %v561_v31 = vsub.f32 %v557_v27, %v559_v25 }
 0x3ef   :  { %v825_v19 = vpop.eup %824  ;;  %v565_v33 = vadd.f32 1e-05, %v561_v31 }
 0x3f0   :  { %v567_v12 = vmul.f32 %v825_v19, %v564_v10  ;;  %vm573_vm1 = vweird.f32 %v825_v19 }
 0x3f1   :  { %826 = vrsqrt.f32 %v565_v33  ;;  %vm574_vm7 = vmor %vm572_vm6, %vm573_vm1  ;;  %vm582_vm9 = vweird.f32 %v565_v33 }
 0x3f2   :  { %v568_v36 = vmul.f32 %v825_v19, %v567_v12 }
 0x3f4   :  { %v569_v38 = vmul.f32 0.5, %v568_v36 }
 0x3f6   :  { %v570_v28 = vsub.f32 1.5, %v569_v38 }
 0x3f7   :  { %v827_v40 = vpop.eup %826 }
 0x3f8   :  { %v571_v49 = vmul.f32 %v825_v19, %v570_v28  ;;  %v577_v43 = vmul.f32 %v827_v40, %v565_v33  ;;  %vm583_vm8 = vweird.f32 %v827_v40 }
 0x3f9   :  { %vm584_vm10 = vmor %vm582_vm9, %vm583_vm8 }
 0x3fa   :  { %v575_v44 = vsel %vm574_vm7, %v825_v19, %v571_v49  ;;  %v578_v13 = vmul.f32 %v827_v40, %v577_v43 }
 0x3fb   :  { %v586_v45 = vmul.f32 %v575_v44, %v562_v30 }
 0x3fc   :  { %v579_v47 = vmul.f32 0.5, %v578_v13 }
 0x3fd   :  { %v589_v20 = vmul.f32 %v786_v23, %v586_v45 }
 0x3fe   :  { %v580_v51 = vsub.f32 1.5, %v579_v47 }
 0x3ff   :  { %v592_v52 = vadd.f32 %v787_v18, %v589_v20 }
 0x400   :  { %v581_v26 = vmul.f32 %v827_v40, %v580_v51 }
 0x401   :  { %772 = vmatmul.msk.f32.vlgmr.msra.gmra.mxu2 %vm40_vm0, %v592_v52 }
 0x402   :  { %v585_v54 = vsel %vm584_vm10, %v827_v40, %v581_v26 }
 0x403   :  { %v587_v56 = vmul.f32 %v585_v54, %v563_v53 }
 0x405   :  { %v590_v57 = vmul.f32 %v786_v23, %v587_v56 }
 0x407   :  { %v593_v58 = vadd.f32 %v787_v18, %v590_v57  ;;  %v791_v18 = vld [vmem:[%s1324_s4 + $0x26] ss:$0 sm:$0xff]  ;;  %s859_s4 = smov 128  }
 0x409   :  { %773 = vmatmul.msk.f32.gmra.mxu2 %vm40_vm0, %v593_v58 }
 0x484   :  { %v622_v16 = vpop.f32.mrf.mxu2 }
 0x485   :  { %v623_v63 = vadd.f32 %v788_v62, %v622_v16 }
 0x487   :  { %v628_v0 = vmax.f32 %v623_v63, 0.0 }
 0x489   :  { %663 = vmatmul.f32.vlgmr.msrb.gmra.mxu1 %v628_v0 }
 0x48c   :  { %v625_v9 = vpop.f32.mrf.mxu2 }
 0x48d   :  { %v626_v1 = vadd.f32 %v788_v62, %v625_v9 }
 0x48f   :  { %v629_v2 = vmax.f32 %v626_v1, 0.0 }
 0x491   :  { %666 = vmatmul.f32.gmra.mxu1 %v629_v2 }
 0x506   :  { %v664_v11 = vpop.f32.mrf.mxu1 }
 0x507   :  { %v665_v4 = vadd.f32 %v789_v3, %v664_v11 }
 0x509   :  { %v670_v5 = vadd.f32 %v665_v4, %v592_v52 }
 0x50b   :  { %v672_v61 = vsel %vm40_vm0, %v670_v5, 0.0  ;;  %v678_v6 = vmul.f32 %v670_v5, %v670_v5 }
 0x50c   :  { %673 = vadd.xlane.f32.xlu2 %v672_v61 }
 0x50d   :  { %v680_v55 = vsel %vm40_vm0, %v678_v6, 0.0 }
 0x50e   :  { %681 = vadd.xlane.f32.xlu1 %v680_v55  ;;  %v667_v7 = vpop.f32.mrf.mxu1 }
 0x50f   :  { %v668_v8 = vadd.f32 %v789_v3, %v667_v7 }
 0x511   :  { %v671_v10 = vadd.f32 %v668_v8, %v593_v58 }
 0x513   :  { %v675_v14 = vsel %vm40_vm0, %v671_v10, 0.0  ;;  %v679_v15 = vmul.f32 %v671_v10, %v671_v10 }
 0x514   :  { %676 = vadd.xlane.f32.xlu0 %v675_v14 }
 0x515   :  { %v683_v17 = vsel %vm40_vm0, %v679_v15, 0.0 }
 0x516   :  { %684 = vadd.xlane.f32.xlu2 %v683_v17 }
 0x57f   :  { %v674_v21 = vpop.xlane.xlu2 %673 }
 0x580   :  { %v686_v50 = vmul.f32 0.03125, %v674_v21 }
 0x581   :  { %v682_v25 = vpop.xlane.xlu1 %681 }
 0x582   :  { %v690_v27 = vmul.f32 %v686_v50, %v686_v50  ;;  %v688_v29 = vmul.f32 0.03125, %v682_v25  ;;  %v694_v23 = vsub.f32 %v670_v5, %v686_v50 }
 0x584   :  { %v692_v31 = vsub.f32 %v688_v29, %v690_v27 }
 0x586   :  { %v696_v32 = vadd.f32 1e-05, %v692_v31 }
 0x587   :  { %v677_v19 = vpop.xlane.xlu0 %676 }
 0x588   :  { %828 = vrsqrt.f32 %v696_v32  ;;  %v687_v33 = vmul.f32 0.03125, %v677_v19  ;;  %vm704_vm12 = vweird.f32 %v696_v32 }
 0x589   :  { %v685_v34 = vpop.xlane.xlu2 %684 }
 0x58a   :  { %v691_v12 = vmul.f32 %v687_v33, %v687_v33  ;;  %v689_v35 = vmul.f32 0.03125, %v685_v34  ;;  %v695_v52 = vsub.f32 %v671_v10, %v687_v33 }
 0x58c   :  { %v693_v36 = vsub.f32 %v689_v35, %v691_v12 }
 0x58e   :  { %v829_v37 = vpop.eup %828  ;;  %v697_v38 = vadd.f32 1e-05, %v693_v36 }
 0x58f   :  { %v699_v39 = vmul.f32 %v829_v37, %v696_v32  ;;  %vm705_vm11 = vweird.f32 %v829_v37 }
 0x590   :  { %830 = vrsqrt.f32 %v697_v38  ;;  %vm706_vm13 = vmor %vm704_vm12, %vm705_vm11  ;;  %vm714_vm15 = vweird.f32 %v697_v38 }
 0x591   :  { %v700_v28 = vmul.f32 %v829_v37, %v699_v39 }
 0x593   :  { %v701_v40 = vmul.f32 0.5, %v700_v28 }
 0x595   :  { %v702_v42 = vsub.f32 1.5, %v701_v40 }
 0x596   :  { %v831_v49 = vpop.eup %830 }
 0x597   :  { %v703_v43 = vmul.f32 %v829_v37, %v702_v42  ;;  %v709_v30 = vmul.f32 %v831_v49, %v697_v38  ;;  %vm715_vm14 = vweird.f32 %v831_v49 }
 0x598   :  { %vm716_vm2 = vmor %vm714_vm15, %vm715_vm14 }
 0x599   :  { %v707_v44 = vsel %vm706_vm13, %v829_v37, %v703_v43  ;;  %v710_v13 = vmul.f32 %v831_v49, %v709_v30 }
 0x59a   :  { %v718_v45 = vmul.f32 %v707_v44, %v694_v23 }
 0x59b   :  { %v711_v46 = vmul.f32 0.5, %v710_v13 }
 0x59c   :  { %v721_v47 = vmul.f32 %v790_v22, %v718_v45 }
 0x59d   :  { %v712_v20 = vsub.f32 1.5, %v711_v46 }
 0x59e   :  { %v724_v48 = vadd.f32 %v791_v18, %v721_v47 }
 0x59f   :  { %v713_v51 = vmul.f32 %v831_v49, %v712_v20 }
 0x5a0   :  { %726 = vst.msk [vmem:[#allocation2] sm:$0xff] %vm40_vm0, %v724_v48 }
 0x5a1   :  { %v717_v24 = vsel %vm716_vm2, %v831_v49, %v713_v51 }
 0x5a2   :  { %v719_v26 = vmul.f32 %v717_v24, %v695_v52 }
 0x5a4   :  { %v722_v53 = vmul.f32 %v790_v22, %v719_v26 }
 0x5a6   :  { %v725_v54 = vadd.f32 %v791_v18, %v722_v53 }
 0x5a8   :  { %727 = vst.msk [vmem:[#allocation2 + $0x8] sm:$0xff] %vm40_vm0, %v725_v54 }
 0x5a9   :  { %740 = dma.vmem_to_hbm [thread:$0]  %s733_s27, 256, %s735_s29, [#allocation3], %s859_s4, %s859_s4, %s860_s30  }
 0x5aa   :  { %856 = dma.done.wait [#allocation3], 256  }
 0x5ab   :  { %857 = vsyncadd [#allocation3], 4294967040 }
 0x5ac   :  { %745 = vsyncpa [#allocation3], 1 }

</bundles_post_ra>
